<compile_context>
chip_gen: v7x
topology: tpu7x:2x2x1
jax: 0.10.0
libtpu: 0.0.40
codegen_flags: <defaults>
</compile_context>

<pallas_src>
import jax
import jax.numpy as jnp
from jax.experimental import pallas as pl
from jax.experimental.pallas import tpu as pltpu


def rbfn_kernel(x_ref, ct_ref, csq_ref, wt_ref, b_ref, nis_ref, o_ref):
    # x:   (T, d_i)        row tile of the batch
    # ct:  (d_i, d_h)      centers, pre-transposed (resident)
    # csq: (1, d_h)        ||c_h||^2 per center (resident)
    # wt:  (d_h, d_o_pad)  Linear weight, pre-transposed + lane-padded (resident)
    # b:   (1, d_o_pad)    Linear bias, lane-padded (resident)
    # nis: (1, 1) SMEM     -1 / sigma^2
    x = x_ref[...]
    x_sq = jnp.sum(x * x, axis=1, keepdims=True)                         # (T, 1)
    cross = jnp.dot(x, ct_ref[...], preferred_element_type=jnp.float32)  # (T, d_h)  MXU
    # Guard tiny negative distances from cancellation before the exp.
    sq = jnp.maximum(x_sq + csq_ref[...] - 2.0 * cross, 0.0)             # (T, d_h)
    h = jnp.exp(sq * nis_ref[0, 0])                                      # (T, d_h)  EUP
    o = jnp.dot(h, wt_ref[...], preferred_element_type=jnp.float32)      # (T, d_o_pad) MXU
    o_ref[...] = o + b_ref[...]


def _round_up(v, m):
    return ((v + m - 1) // m) * m


def rbfn_forward(x, centers, weight, bias, sigma, *, tile_n=512):
    """x: (N, d_i); centers: (d_h, d_i); weight: (d_o, d_h); bias: (d_o,)."""
    N, d_i = x.shape
    d_h, _ = centers.shape
    d_o = weight.shape[0]

    # Row tile: multiple of 8 sublanes, capped to the (padded) batch size.
    tile_n = max(8, min(_round_up(tile_n, 8), _round_up(N, 8)))
    n_pad = _round_up(N, tile_n)
    # Lane-dense output: pad d_o up to a multiple of 128 (unmasked vst).
    d_o_pad = _round_up(d_o, 128)

    f32 = jnp.float32
    x_p = jnp.zeros((n_pad, d_i), f32).at[:N].set(x.astype(f32))
    centers_f = centers.astype(f32)
    centers_t = centers_f.T                                       # (d_i, d_h)
    c_sq = jnp.sum(centers_f * centers_f, axis=1)[None, :]        # (1, d_h)
    w_t = jnp.zeros((d_h, d_o_pad), f32).at[:, :d_o].set(weight.astype(f32).T)
    b_p = jnp.zeros((1, d_o_pad), f32).at[:, :d_o].set(bias.astype(f32).reshape(1, d_o))
    neg_inv_sig2 = jnp.asarray(-1.0 / (jnp.asarray(sigma, f32) ** 2), f32).reshape(1, 1)

    grid = (n_pad // tile_n,)
    out = pl.pallas_call(
        rbfn_kernel,
        out_shape=jax.ShapeDtypeStruct((n_pad, d_o_pad), f32),
        grid=grid,
        in_specs=[
            pl.BlockSpec((tile_n, d_i), lambda i: (i, 0)),        # x row tile (pipelined)
            pl.BlockSpec((d_i, d_h), lambda i: (0, 0)),           # centers^T (resident)
            pl.BlockSpec((1, d_h), lambda i: (0, 0)),             # ||c||^2   (resident)
            pl.BlockSpec((d_h, d_o_pad), lambda i: (0, 0)),       # W^T padded (resident)
            pl.BlockSpec((1, d_o_pad), lambda i: (0, 0)),         # bias padded (resident)
            pl.BlockSpec(memory_space=pltpu.MemorySpace.SMEM),    # -1/sigma^2 scalar
        ],
        out_specs=pl.BlockSpec((tile_n, d_o_pad), lambda i: (i, 0)),
        compiler_params=pltpu.CompilerParams(
            dimension_semantics=("parallel",),
        ),
    )(x_p, centers_t, c_sq, w_t, b_p, neg_inv_sig2)
    return out[:N, :d_o]


def rbfn_reference(x, centers, weight, bias, sigma):
    A = x[:, None, :]                    # (N, 1, d_i)
    B = centers[None, :, :]              # (1, d_h, d_i)
    H = jnp.exp(-jnp.sum((A - B) ** 2, axis=2) / (sigma ** 2))
    return H @ weight.T + bias


if __name__ == "__main__":
    # Small shapes consistent with the module: d_i input dim, d_h centers, d_o outputs.
    N, d_i, d_h, d_o = 8, 16, 32, 4

    key = jax.random.PRNGKey(0)
    k_x, k_c, k_w = jax.random.split(key, 3)

    x = jax.random.normal(k_x, (N, d_i), dtype=jnp.float32)

    # Deterministic parameter init mirroring __init__:
    #   centers ~ U[0,1) (torch.rand), Linear.weight ~ N(0, 0.02), Linear.bias = 0.
    centers = jax.random.uniform(k_c, (d_h, d_i), dtype=jnp.float32)
    weight = 0.02 * jax.random.normal(k_w, (d_o, d_h), dtype=jnp.float32)
    bias = jnp.zeros((d_o,), dtype=jnp.float32)

    # TODO(synk): `self.sigmas` is assigned outside __init__ in the original code
    # (during training); use a fixed deterministic value here.
    sigma = 1.0

    out = rbfn_forward(x, centers, weight, bias, sigma)
    out = jax.block_until_ready(out)

    ref = rbfn_reference(x, centers, weight, bias, sigma)
    assert out.shape == (N, d_o)
    assert jnp.allclose(out, ref, atol=1e-5, rtol=1e-4)

    print("KERNEL_OK")
</pallas_src>

<mosaic_0001>
module attributes {stable_mosaic.version = 11 : i64} {
  func.func @rbfn_kernel(%arg0: i32, %arg1: memref<8x16xf32, #tpu.memory_space<vmem>>, %arg2: memref<16x32xf32, #tpu.memory_space<vmem>>, %arg3: memref<1x32xf32, #tpu.memory_space<vmem>>, %arg4: memref<32x128xf32, #tpu.memory_space<vmem>>, %arg5: memref<1x128xf32, #tpu.memory_space<vmem>>, %arg6: memref<1x1xf32, #tpu.memory_space<smem>>, %arg7: memref<8x128xf32, #tpu.memory_space<vmem>>) attributes {dimension_semantics = [#tpu.dimension_semantics<parallel>], iteration_bounds = array<i64: 1>, scalar_prefetch = 0 : i64, scratch_operands = 0 : i64, tpu.core_type = #tpu.core_type<tc>, window_params = [{transform_indices = @transform_0, window_bounds = array<i64: 8, 16>}, {pipeline_mode = #tpu.pipeline_mode<synchronous>, transform_indices = @transform_1, window_bounds = array<i64: 16, 32>}, {pipeline_mode = #tpu.pipeline_mode<synchronous>, transform_indices = @transform_2, window_bounds = array<i64: 1, 32>}, {pipeline_mode = #tpu.pipeline_mode<synchronous>, transform_indices = @transform_3, window_bounds = array<i64: 32, 128>}, {pipeline_mode = #tpu.pipeline_mode<synchronous>, transform_indices = @transform_4, window_bounds = array<i64: 1, 128>}, {transform_indices = @transform_5, window_bounds = array<i64: 1, 1>}, {transform_indices = @transform_6, window_bounds = array<i64: 8, 128>}]} {
    %c0 = arith.constant 0 : index
    %c0_0 = arith.constant 0 : index
    %0 = vector.load %arg1[%c0, %c0_0] : memref<8x16xf32, #tpu.memory_space<vmem>>, vector<8x16xf32>
    %1 = arith.mulf %0, %0 : vector<8x16xf32>
    %cst = arith.constant dense<0.000000e+00> : vector<8xf32>
    %2 = vector.multi_reduction <add>, %1, %cst [1] : vector<8x16xf32> to vector<8xf32>
    %3 = vector.shape_cast %2 : vector<8xf32> to vector<8x1xf32>
    %c0_1 = arith.constant 0 : index
    %c0_2 = arith.constant 0 : index
    %4 = vector.load %arg2[%c0_1, %c0_2] : memref<16x32xf32, #tpu.memory_space<vmem>>, vector<16x32xf32>
    %cst_3 = arith.constant dense<0.000000e+00> : vector<8x32xf32>
    %5 = tpu.matmul %0, %4, %cst_3 {dimension_numbers = #tpu.dot_dimension_numbers<[1], [0], [0], [1], [0, 0, 1, 1], [], []>} : vector<8x16xf32>, vector<16x32xf32>, vector<8x32xf32> -> vector<8x32xf32>
    %c0_4 = arith.constant 0 : index
    %c0_5 = arith.constant 0 : index
    %6 = vector.load %arg3[%c0_4, %c0_5] : memref<1x32xf32, #tpu.memory_space<vmem>>, vector<1x32xf32>
    %7 = vector.broadcast %3 : vector<8x1xf32> to vector<8x32xf32>
    %8 = vector.broadcast %6 : vector<1x32xf32> to vector<8x32xf32>
    %9 = arith.addf %7, %8 : vector<8x32xf32>
    %cst_6 = arith.constant 2.000000e+00 : f32
    %10 = vector.broadcast %cst_6 : f32 to vector<8x32xf32>
    %11 = arith.mulf %10, %5 : vector<8x32xf32>
    %12 = arith.subf %9, %11 : vector<8x32xf32>
    %cst_7 = arith.constant 0.000000e+00 : f32
    %13 = vector.broadcast %cst_7 : f32 to vector<8x32xf32>
    %14 = arith.maximumf %12, %13 : vector<8x32xf32>
    %c0_8 = arith.constant 0 : index
    %c0_9 = arith.constant 0 : index
    %15 = memref.load %arg6[%c0_8, %c0_9] : memref<1x1xf32, #tpu.memory_space<smem>>
    %16 = vector.broadcast %15 : f32 to vector<8x32xf32>
    %17 = arith.mulf %14, %16 : vector<8x32xf32>
    %18 = math.exp %17 : vector<8x32xf32>
    %c0_10 = arith.constant 0 : index
    %c0_11 = arith.constant 0 : index
    %19 = vector.load %arg4[%c0_10, %c0_11] : memref<32x128xf32, #tpu.memory_space<vmem>>, vector<32x128xf32>
    %cst_12 = arith.constant dense<0.000000e+00> : vector<8x128xf32>
    %20 = tpu.matmul %18, %19, %cst_12 {dimension_numbers = #tpu.dot_dimension_numbers<[1], [0], [0], [1], [0, 0, 1, 1], [], []>} : vector<8x32xf32>, vector<32x128xf32>, vector<8x128xf32> -> vector<8x128xf32>
    %c0_13 = arith.constant 0 : index
    %c0_14 = arith.constant 0 : index
    %21 = vector.load %arg5[%c0_13, %c0_14] : memref<1x128xf32, #tpu.memory_space<vmem>>, vector<1x128xf32>
    %22 = vector.broadcast %21 : vector<1x128xf32> to vector<8x128xf32>
    %23 = arith.addf %20, %22 : vector<8x128xf32>
    %c0_15 = arith.constant 0 : index
    %c0_16 = arith.constant 0 : index
    %24 = vector.load %arg7[%c0_15, %c0_16] : memref<8x128xf32, #tpu.memory_space<vmem>>, vector<8x128xf32>
    tpu.vector_store %arg7[%c0_15, %c0_16], %23 {strides = array<i32>} : memref<8x128xf32, #tpu.memory_space<vmem>>, vector<8x128xf32>,
    return
  }
  func.func @transform_0(%arg0: i32) -> (i32, i32) {
    %c0_i32 = arith.constant 0 : i32
    %c0_i32_0 = arith.constant 0 : i32
    return %arg0, %c0_i32 : i32, i32
  }
  func.func @transform_1(%arg0: i32) -> (i32, i32) {
    %c0_i32 = arith.constant 0 : i32
    %c0_i32_0 = arith.constant 0 : i32
    %c0_i32_1 = arith.constant 0 : i32
    return %c0_i32, %c0_i32_0 : i32, i32
  }
  func.func @transform_2(%arg0: i32) -> (i32, i32) {
    %c0_i32 = arith.constant 0 : i32
    %c0_i32_0 = arith.constant 0 : i32
    %c0_i32_1 = arith.constant 0 : i32
    return %c0_i32, %c0_i32_0 : i32, i32
  }
  func.func @transform_3(%arg0: i32) -> (i32, i32) {
    %c0_i32 = arith.constant 0 : i32
    %c0_i32_0 = arith.constant 0 : i32
    %c0_i32_1 = arith.constant 0 : i32
    return %c0_i32, %c0_i32_0 : i32, i32
  }
  func.func @transform_4(%arg0: i32) -> (i32, i32) {
    %c0_i32 = arith.constant 0 : i32
    %c0_i32_0 = arith.constant 0 : i32
    %c0_i32_1 = arith.constant 0 : i32
    return %c0_i32, %c0_i32_0 : i32, i32
  }
  func.func @transform_5(%arg0: i32) -> (i32, i32) {
    %c0_i32 = arith.constant 0 : i32
    %c0_i32_0 = arith.constant 0 : i32
    %c0_i32_1 = arith.constant 0 : i32
    return %c0_i32, %c0_i32_0 : i32, i32
  }
  func.func @transform_6(%arg0: i32) -> (i32, i32) {
    %c0_i32 = arith.constant 0 : i32
    %c0_i32_0 = arith.constant 0 : i32
    return %arg0, %c0_i32 : i32, i32
  }
}

</mosaic_0001>

<bundles_post_ra>
// kernel: tpu_custom_call.1
= control target key start
LH: loop header
LB: loop body
LE: loop exit
PB: predicated region body
PF: predicated region fallthrough
CT: control target
= control target key end

     0   :  { %12 = vsyncpa [#allocation4], 0  ;;  %s514_s0 = inlined_call_operand.hbm [shape: f32[8,16], index: 0, kind: input, shape index: {}]   ;;  %s515_s1 = inlined_call_operand.hbm [shape: f32[16,32], index: 1, kind: input, shape index: {}]   ;;  %s516_s2 = inlined_call_operand.vmem [shape: f32[1,32], index: 2, kind: input, shape index: {}]   ;;  %s517_s3 = inlined_call_operand.hbm [shape: f32[32,128], index: 3, kind: input, shape index: {}]   ;;  %s518_s4 = inlined_call_operand.vmem [shape: f32[1,128], index: 4, kind: input, shape index: {}]   ;;  %s519_s5 = inlined_call_operand.<no memory space> [shape: f32[1,1], index: 5, kind: input, shape index: {}]   ;;  %s520_s6 = inlined_call_operand.hbm [shape: f32[8,128], index: 6, kind: output, shape index: {}]  }
   0x1   :  { %13 = vsyncpa [#allocation7], 0 }
   0x2   :  { %14 = vsyncpa [#allocation5], 0  ;;  %s407_s21 = smov [#allocation6]   ;;  %s313_s25 = scalar_lea.hbm %s515_s1, 256 }
   0x3   :  { %s30_s22 = sshll.u32 %s407_s21, 4  ;;  %p314_p0 = scmp.ne.s32.totalorder %s515_s1, %s313_s25  ;;  %s31_s22 = int_to_ptr.vmem [resolvable:$true] %s30_s22 }
   0x4   :  { %p317_p1 = scmp.lt.u32.totalorder %s313_s25, %s515_s1 }
   0x6   :  { %p319_p2 = pnand %p317_p1, %p314_p0 }
   0x8   :  { %322 = shalt.err (!%p319_p2)
}
   0x9   :  { %s323_s30 = scalar_lea.vmem %s31_s22, 256  ;;  %p328_p4 = scmp.lt.s32.totalorder %s31_s22, %s31_s22 }
   0xa   :  { %p324_p3 = scmp.ne.s32.totalorder %s31_s22, %s323_s30  ;;  %p329_p5 = scmp.lt.s32.totalorder %s323_s30, %s323_s30 }
   0xc   :  { %p330_p6 = por %p329_p5, %p328_p4 }
   0xe   :  { %p331_p7 = pnand %p330_p6, %p324_p3 }
  0x10   :  { %334 = shalt.err (!%p331_p7)
}
  0x11   :  { %s408_s7 = smov 128   ;;  %s409_s8 = smov 8  }
  0x12   :  { %36 = dma.hbm_to_vmem [thread:$0]  %s515_s1, 256, %s31_s22, [#allocation7], %s408_s7, %s408_s7, %s409_s8  }
  0x13   :  { %s410_s11 = smov [#allocation3]   ;;  %s411_s13 = smov [#allocation8]  }
  0x14   :  { %s21_s12 = sshll.u32 %s410_s11, 4  ;;  %s44_s14 = sshll.u32 %s411_s13, 4  ;;  %s22_s12 = int_to_ptr.vmem [resolvable:$true] %s21_s12  ;;  %s45_s14 = int_to_ptr.vmem [resolvable:$true] %s44_s14 }
  0x15   :  { %s335_s17 = scalar_lea.hbm %s514_s0, 128 }
  0x16   :  { %p336_p8 = scmp.ne.s32.totalorder %s514_s0, %s335_s17  ;;  %p339_p9 = scmp.lt.u32.totalorder %s335_s17, %s514_s0 }
  0x18   :  { %p341_p10 = pnand %p339_p9, %p336_p8 }
  0x1a   :  { %344 = shalt.err (!%p341_p10)
}
  0x1b   :  { %s345_s1 = scalar_lea.vmem %s22_s12, 128  ;;  %p350_p12 = scmp.lt.s32.totalorder %s22_s12, %s22_s12 }
  0x1c   :  { %p346_p11 = scmp.ne.s32.totalorder %s22_s12, %s345_s1  ;;  %p351_p13 = scmp.lt.s32.totalorder %s345_s1, %s345_s1 }
  0x1e   :  { %p352_p0 = por %p351_p13, %p350_p12 }
  0x20   :  { %p353_p1 = pnand %p352_p0, %p346_p11 }
  0x22   :  { %356 = shalt.err (!%p353_p1)
}
  0x23   :  { %24 = dma.hbm_to_vmem [thread:$0]  %s514_s0, 128, %s22_s12, [#allocation4]  }
  0x24   :  { %s357_s26 = scalar_lea.hbm %s517_s3, 512 }
  0x25   :  { %p358_p2 = scmp.ne.s32.totalorder %s517_s3, %s357_s26  ;;  %p361_p3 = scmp.lt.u32.totalorder %s357_s26, %s517_s3 }
  0x27   :  { %p363_p4 = pnand %p361_p3, %p358_p2 }
  0x29   :  { %366 = shalt.err (!%p363_p4)
}
  0x2a   :  { %s367_s9 = scalar_lea.vmem %s45_s14, 512  ;;  %p372_p6 = scmp.lt.s32.totalorder %s45_s14, %s45_s14 }
  0x2b   :  { %p368_p5 = scmp.ne.s32.totalorder %s45_s14, %s367_s9  ;;  %p373_p7 = scmp.lt.s32.totalorder %s367_s9, %s367_s9 }
  0x2d   :  { %p374_p8 = por %p373_p7, %p372_p6 }
  0x2f   :  { %p375_p9 = pnand %p374_p8, %p368_p5 }
  0x31   :  { %378 = shalt.err (!%p375_p9)
}
  0x32   :  { %50 = dma.hbm_to_vmem [thread:$0]  %s517_s3, 512, %s45_s14, [#allocation7], %s408_s7, %s408_s7, %s409_s8  }
  0x33   :  { %401 = dma.done.wait [#allocation4], 128  }
  0x34   :  { %402 = vsyncadd [#allocation4], 4294967168 }
  0x35   :  { %403 = dma.done.wait [#allocation7], 768  }
  0x36   :  { %404 = vsyncadd [#allocation7], 4294966528  ;;  %v412_v0 = vmov 0.0|0.0   ;;  %vm413_vm0 = vmmov 0   ;;  %v414_v1 = vmov 0.0   ;;  %v70_v2 = vld [vmem:[#allocation6] sm:$0xff]  ;;  %v157_v21 = vstv %s519_s5 }
  0x37   :  { %293 = vmatprep.subr.bf16.mxu0 %v412_v0  ;;  %279 = vmatprep.mubr.msk.f32.mxu0 %vm413_vm0, %v414_v1  ;;  %v71_v3 = vld [vmem:[#allocation6 + $0x8] sm:$0xff]  ;;  %v64_v4 = vld [vmem:[#allocation3] sm:$0xff]  ;;  %vm66_vm1 = vcmask 130048   ;;  %v161_v8 = vld [vmem:[#allocation8] sm:$0xff]  ;;  %vm172_vm2 = vcmask 261120  }
  0x38   :  { %296 = vmatprep.subr.bf16.mxu1 %v412_v0  ;;  %290 = vmatprep.mubr.msk.f32.mxu1 %vm413_vm0, %v414_v1  ;;  %v294_v5 = vpack.c.bf16 %v71_v3, %v70_v2  ;;  %v65_v6 = vmul.f32 %v64_v4, %v64_v4  ;;  %v162_v9 = vld [vmem:[#allocation8 + $0x8] sm:$0xff]  ;;  %v163_v10 = vld [vmem:[#allocation8 + $0x10] sm:$0xff]  ;;  %v164_v12 = vld [vmem:[#allocation8 + $0x18] sm:$0xff] }
  0x39   :  { %v297_v11 = vpack.c.bf16 %v162_v9, %v161_v8  ;;  %v300_v13 = vpack.c.bf16 %v164_v12, %v163_v10  ;;  %v264_v15 = vld [vmem:[%s516_s2] ss:$0 sm:$0xff]  ;;  %s415_s2 = smov [#allocation9]  }
  0x3a   :  { %295 = vmatpush3.bf16.msra.mxu0 %v294_v5  ;;  %v67_v7 = vsel %vm66_vm1, %v65_v6, 0.0  ;;  %v265_v26 = vld [vmem:[%s518_s4] ss:$0 sm:$0xff]  ;;  %s253_s14 = sshll.u32 %s415_s2, 4  ;;  %s254_s14 = int_to_ptr.vmem [resolvable:$true] %s253_s14 }
  0x3b   :  { %68 = vadd.xlane.f32.xlu0 %v67_v7  ;;  %298 = vmatpush3.bf16.msra.mxu1 %v297_v11  ;;  %s379_s15 = scalar_lea.vmem %s254_s14, 128  ;;  %p384_p11 = scmp.lt.s32.totalorder %s254_s14, %s254_s14 }
  0x3c   :  { %299 = vmatprep.subr.bf16.mxu1 %v412_v0  ;;  %p380_p10 = scmp.ne.s32.totalorder %s254_s14, %s379_s15  ;;  %p385_p12 = scmp.lt.s32.totalorder %s379_s15, %s379_s15 }
  0x3d   :  { %280 = vmatmul.mubr.msk.f32.vlgmr.msra.gmra.mrb[0].mxu0 %vm66_vm1, %v64_v4 }
  0x3e   :  { %p386_p13 = por %p385_p12, %p384_p11 }
  0x3f   :  { %301 = vmatpush3.bf16.msra.mxu1 %v300_v13 }
  0x40   :  { %p387_p0 = pnand %p386_p13, %p380_p10 }
  0xc8   :  { %v69_v14 = vpop.xlane.xlu0 %68 }
  0xc9   :  { %v152_v16 = vadd.f32 %v264_v15, %v69_v14 }
 0x110   :  { %v141_v17 = vpop.f32.mrb[0].mxu0 }
 0x111   :  { %v153_v18 = vmul.f32 2.0, %v141_v17  ;;  %v281_v19 = vpop.f32.mrb[1].mxu0 }
 0x113   :  { %v154_v20 = vsub.f32 %v152_v16, %v153_v18 }
 0x115   :  { %v155_v22 = vmax.f32 %v154_v20, 0.0 }
 0x117   :  { %v158_v23 = vmul.f32 %v157_v21, %v155_v22 }
 0x119   :  { %v159_v24 = vmul.f32 1.442695, %v158_v23 }
 0x11b   :  { %311 = vpow2.f32 %v159_v24 }
 0x125   :  { %v312_v25 = vpop.eup %311 }
 0x126   :  { %291 = vmatmul.mubr.msk.f32.vlgmr.msra.gmra.mrb[0].mxu1 %vm172_vm2, %v312_v25 }
 0x1f9   :  { %v242_v27 = vpop.f32.mrb[0].mxu1 }
 0x1fa   :  { %v243_v28 = vadd.f32 %v265_v26, %v242_v27  ;;  %v292_v29 = vpop.f32.mrb[1].mxu1 }
 0x1fc   :  { %246 = vst [vmem:[#allocation9] sm:$0xff] %v243_v28 }
 0x1fd   :  { %390 = shalt.err (!%p387_p0)
}
 0x1fe   :  { %s391_s17 = scalar_lea.hbm %s520_s6, 128 }
 0x1ff   :  { %p392_p1 = scmp.ne.s32.totalorder %s520_s6, %s391_s17  ;;  %p395_p2 = scmp.lt.u32.totalorder %s391_s17, %s520_s6 }
 0x201   :  { %p397_p3 = pnand %p395_p2, %p392_p1 }
 0x203   :  { %400 = shalt.err (!%p397_p3)
}
 0x204   :  { %256 = dma.vmem_to_hbm [thread:$0]  %s254_s14, 128, %s520_s6, [#allocation5]  }
 0x205   :  { %405 = dma.done.wait [#allocation5], 128  }
 0x206   :  { %406 = vsyncadd [#allocation5], 4294967168 }
 0x207   :  { %260 = vsyncpa [#allocation4], 1 }
 0x208   :  { %261 = vsyncpa [#allocation7], 1 }
 0x209   :  { %262 = vsyncpa [#allocation5], 1 }

</bundles_post_ra>
